<compile_context>
chip_gen: v7x
topology: tpu7x:2x2x1
jax: 0.10.0
libtpu: 0.0.40
codegen_flags: <defaults>
</compile_context>

<pallas_src>
import math

import jax
import jax.numpy as jnp
from jax import lax
from jax.experimental import pallas as pl
from jax.experimental.pallas import tpu as pltpu


def mlp_kernel(x_ref, w1_ref, b1_ref, w2_ref, b2_ref, w3_ref, b3_ref, o_ref):
    # x_ref: (TB, F) f32, native layout.  Cast to bf16 for the MXU; the
    # contraction below consumes x's feature axis directly, so the
    # batch-on-lanes relayout happens inside the kernel (XLU, otherwise idle).
    xb = x_ref[...].astype(jnp.bfloat16)                       # (TB, 8)

    # ---- layer 1: Linear(8 -> 32) + ReLU;  z1[o, b] = sum_f W1[o, f] x[b, f]
    z1 = lax.dot_general(w1_ref[...], xb,
                         dimension_numbers=(((1,), (1,)), ((), ())),
                         preferred_element_type=jnp.float32) + b1_ref[...]
    a1 = jnp.maximum(z1, 0.0)                                  # (32, TB) f32

    # ---- layer 2: Linear(32 -> 16) with BN1 folded in, LeakyReLU(0.01) ----
    z2 = jnp.dot(w2_ref[...], a1.astype(w2_ref.dtype),
                 preferred_element_type=jnp.float32) + b2_ref[...]
    a2 = jnp.maximum(z2, 0.01 * z2)                            # (16, TB) f32

    # ---- layer 3: Linear(16 -> 1) with BN2 folded in, as VPU multiply +
    #      sublane reduce (skip a nearly-empty MXU pass), then sigmoid ----
    z3 = jnp.sum(w3_ref[...] * a2, axis=0, keepdims=True) + b3_ref[...]  # (1, TB)
    o_ref[...] = jax.nn.sigmoid(z3).astype(o_ref.dtype)


def _choose_block_b(batch, requested=None, max_block_b=16 * 1024):
    """Pick a batch tile: multiple of 128, capped, >=2 grid steps if possible."""
    b128 = ((batch + 127) // 128) * 128
    if requested is not None:
        bb = int(requested)
    else:
        bb = min(int(max_block_b), b128)
        # Prefer >= 2 grid steps so the ("parallel",) batch axis can split
        # across both TensorCores on v7x (one block = one step = one core).
        if b128 >= 256 and pl.cdiv(b128, bb) < 2:
            bb = max(128, ((b128 // 2 + 127) // 128) * 128)
    assert bb % 128 == 0, "block_b must be a multiple of 128 (lane tiling)"
    return bb


def neural_network_forward(x, kparams, *, block_b=None, max_block_b=16 * 1024,
                           vmem_limit_bytes=None):
    """x: (B, F) float32, native layout. kparams: dict from prepare_kernel_params()."""
    B, F = x.shape
    bb = _choose_block_b(B, block_b, max_block_b)
    nb = pl.cdiv(B, bb)                      # boundary block is masked by Pallas

    rep2 = lambda i: (0, 0)                  # weights / biases: same block every step
    in_specs = [
        pl.BlockSpec((bb, F), lambda i: (i, 0)),      # x tiled on batch, native layout
        pl.BlockSpec(kparams["w1"].shape, rep2),
        pl.BlockSpec(kparams["b1"].shape, rep2),
        pl.BlockSpec(kparams["w2"].shape, rep2),
        pl.BlockSpec(kparams["b2"].shape, rep2),
        pl.BlockSpec(kparams["w3"].shape, rep2),
        pl.BlockSpec(kparams["b3"].shape, rep2),
    ]
    out_specs = pl.BlockSpec((1, bb), lambda i: (0, i))   # lane-dense bf16 output

    param_bytes = sum(int(v.size) * v.dtype.itemsize for v in kparams.values())
    cost = pl.CostEstimate(
        flops=int(2 * B * (8 * 32 + 32 * 16 + 16)),        # ~1568 * B
        transcendentals=int(B),                            # sigmoid exp
        bytes_accessed=int(x.size * x.dtype.itemsize + 2 * B + param_bytes),
    )

    cp_kwargs = dict(dimension_semantics=("parallel",))
    if vmem_limit_bytes is not None:
        cp_kwargs["vmem_limit_bytes"] = int(vmem_limit_bytes)

    out = pl.pallas_call(
        mlp_kernel,
        out_shape=jax.ShapeDtypeStruct((1, B), jnp.bfloat16),
        grid=(nb,),
        in_specs=in_specs,
        out_specs=out_specs,
        compiler_params=pltpu.CompilerParams(**cp_kwargs),
        cost_estimate=cost,
    )(x, kparams["w1"], kparams["b1"], kparams["w2"], kparams["b2"],
      kparams["w3"], kparams["b3"])

    # (1, B) bf16 -> (B, 1) f32 (tiny final cast; heavy HBM store stays bf16).
    return out.reshape(B, 1).astype(jnp.float32)


def init_params(key):
    """PyTorch-convention parameters: Linear(in,out) weight (out,in), bias (out,).
    BatchNorm1d(C) represented by eval-mode per-feature scale s / shift t."""
    keys = jax.random.split(key, 14)

    def linear(kw, kb, fan_in, fan_out):
        bound = 1.0 / math.sqrt(fan_in)
        w = jax.random.uniform(kw, (fan_out, fan_in), jnp.float32, -bound, bound)
        b = jax.random.uniform(kb, (fan_out,), jnp.float32, -bound, bound)
        return w, b

    def bn(kg, kb, km, kv, c, eps=1e-5):
        gamma = 1.0 + 0.1 * jax.random.normal(kg, (c,), jnp.float32)
        beta = 0.1 * jax.random.normal(kb, (c,), jnp.float32)
        running_mean = 0.1 * jax.random.normal(km, (c,), jnp.float32)
        running_var = jax.random.uniform(kv, (c,), jnp.float32, 0.5, 1.5)
        s = gamma / jnp.sqrt(running_var + eps)
        t = beta - running_mean * s
        return s, t

    w1, b1 = linear(keys[0], keys[1], 8, 32)
    w2, b2 = linear(keys[2], keys[3], 32, 16)
    w3, b3 = linear(keys[4], keys[5], 16, 1)
    s1, t1 = bn(keys[6], keys[7], keys[8], keys[9], 32)
    s2, t2 = bn(keys[10], keys[11], keys[12], keys[13], 16)

    return dict(w1=w1, b1=b1, s1=s1, t1=t1,
                w2=w2, b2=b2, s2=s2, t2=t2,
                w3=w3, b3=b3)


def prepare_kernel_params(p):
    """One-time offline prep: fold BN affines into the following Linear,
    cast MXU weights to bf16, reshape biases to broadcastable columns."""
    # BN1 folded into layer 2:  bn1(relu(z1)) @ W2^T = relu(z1) @ (W2*s1)^T, b2' = b2 + W2 @ t1
    w2f = p["w2"] * p["s1"][None, :]                 # (16, 32)
    b2f = p["b2"] + p["w2"] @ p["t1"]                # (16,)
    # BN2 folded into layer 3
    w3f = p["w3"] * p["s2"][None, :]                 # (1, 16)
    b3f = p["b3"] + p["w3"] @ p["t2"]                # (1,)
    return dict(
        w1=p["w1"].astype(jnp.bfloat16),                      # (32, 8)  bf16 MXU operand
        b1=p["b1"].reshape(-1, 1).astype(jnp.float32),        # (32, 1)
        w2=w2f.astype(jnp.bfloat16),                          # (16, 32) bf16 MXU operand
        b2=b2f.reshape(-1, 1).astype(jnp.float32),            # (16, 1)
        w3=w3f.reshape(-1, 1).astype(jnp.float32),            # (16, 1)  VPU path, f32
        b3=b3f.reshape(1, 1).astype(jnp.float32),             # (1, 1)
    )


def reference_forward(x, p):
    """Pure-JAX f32 reference with the original (unfolded) eval-mode math."""
    z1 = x @ p["w1"].T + p["b1"]
    h1 = jnp.maximum(z1, 0.0) * p["s1"] + p["t1"]
    z2 = h1 @ p["w2"].T + p["b2"]
    h2 = jnp.where(z2 >= 0.0, z2, 0.01 * z2) * p["s2"] + p["t2"]
    return jax.nn.sigmoid(h2 @ p["w3"].T + p["b3"])


if __name__ == "__main__":
    key = jax.random.PRNGKey(0)
    k_x, k_p = jax.random.split(key)

    batch, input_size = 200, 8            # small; auto block_b=128 -> 2 grid steps,
    x = jax.random.normal(k_x, (batch, input_size), jnp.float32)  # exercises boundary mask

    params = init_params(k_p)
    kparams = prepare_kernel_params(params)

    out = neural_network_forward(x, kparams)
    out = jax.block_until_ready(out)

    ref = reference_forward(x, params)
    assert out.shape == (batch, 1)
    # bf16 MXU operands + bf16 output store, f32 accumulation: post-sigmoid
    # probabilities agree with the f32 reference to ~1e-2 (accuracy contract).
    assert jnp.allclose(out, ref, atol=2e-2), "mismatch vs pure-JAX reference"

    print("KERNEL_OK")
</pallas_src>

<mosaic_0001>
module attributes {stable_mosaic.version = 11 : i64} {
  func.func @mlp_kernel(%arg0: i32, %arg1: memref<128x8xf32, #tpu.memory_space<vmem>>, %arg2: memref<32x8xbf16, #tpu.memory_space<vmem>>, %arg3: memref<32x1xf32, #tpu.memory_space<vmem>>, %arg4: memref<16x32xbf16, #tpu.memory_space<vmem>>, %arg5: memref<16x1xf32, #tpu.memory_space<vmem>>, %arg6: memref<16x1xf32, #tpu.memory_space<vmem>>, %arg7: memref<1x1xf32, #tpu.memory_space<vmem>>, %arg8: memref<1x128xbf16, #tpu.memory_space<vmem>>) attributes {dimension_semantics = [#tpu.dimension_semantics<parallel>], iteration_bounds = array<i64: 2>, scalar_prefetch = 0 : i64, scratch_operands = 0 : i64, tpu.core_type = #tpu.core_type<tc>, window_params = [{transform_indices = @transform_0, window_bounds = array<i64: 128, 8>}, {pipeline_mode = #tpu.pipeline_mode<synchronous>, transform_indices = @transform_1, window_bounds = array<i64: 32, 8>}, {pipeline_mode = #tpu.pipeline_mode<synchronous>, transform_indices = @transform_2, window_bounds = array<i64: 32, 1>}, {pipeline_mode = #tpu.pipeline_mode<synchronous>, transform_indices = @transform_3, window_bounds = array<i64: 16, 32>}, {pipeline_mode = #tpu.pipeline_mode<synchronous>, transform_indices = @transform_4, window_bounds = array<i64: 16, 1>}, {pipeline_mode = #tpu.pipeline_mode<synchronous>, transform_indices = @transform_5, window_bounds = array<i64: 16, 1>}, {pipeline_mode = #tpu.pipeline_mode<synchronous>, transform_indices = @transform_6, window_bounds = array<i64: 1, 1>}, {transform_indices = @transform_7, window_bounds = array<i64: 1, 128>}]} {
    %c0 = arith.constant 0 : index
    %c0_0 = arith.constant 0 : index
    %0 = vector.load %arg1[%c0, %c0_0] : memref<128x8xf32, #tpu.memory_space<vmem>>, vector<128x8xf32>
    %1 = arith.truncf %0 : vector<128x8xf32> to vector<128x8xbf16>
    %c0_1 = arith.constant 0 : index
    %c0_2 = arith.constant 0 : index
    %2 = vector.load %arg2[%c0_1, %c0_2] : memref<32x8xbf16, #tpu.memory_space<vmem>>, vector<32x8xbf16>
    %cst = arith.constant dense<0.000000e+00> : vector<32x128xf32>
    %3 = tpu.matmul %2, %1, %cst {dimension_numbers = #tpu.dot_dimension_numbers<[1], [1], [0], [0], [0, 0, 1, 0], [], []>} : vector<32x8xbf16>, vector<128x8xbf16>, vector<32x128xf32> -> vector<32x128xf32>
    %c0_3 = arith.constant 0 : index
    %c0_4 = arith.constant 0 : index
    %4 = vector.load %arg3[%c0_3, %c0_4] : memref<32x1xf32, #tpu.memory_space<vmem>>, vector<32x1xf32>
    %5 = vector.broadcast %4 : vector<32x1xf32> to vector<32x128xf32>
    %6 = arith.addf %3, %5 : vector<32x128xf32>
    %cst_5 = arith.constant 0.000000e+00 : f32
    %7 = vector.broadcast %cst_5 : f32 to vector<32x128xf32>
    %8 = arith.maximumf %6, %7 : vector<32x128xf32>
    %c0_6 = arith.constant 0 : index
    %c0_7 = arith.constant 0 : index
    %9 = vector.load %arg4[%c0_6, %c0_7] : memref<16x32xbf16, #tpu.memory_space<vmem>>, vector<16x32xbf16>
    %10 = arith.truncf %8 : vector<32x128xf32> to vector<32x128xbf16>
    %cst_8 = arith.constant dense<0.000000e+00> : vector<16x128xf32>
    %11 = tpu.matmul %9, %10, %cst_8 {dimension_numbers = #tpu.dot_dimension_numbers<[1], [0], [0], [1], [0, 0, 1, 1], [], []>} : vector<16x32xbf16>, vector<32x128xbf16>, vector<16x128xf32> -> vector<16x128xf32>
    %c0_9 = arith.constant 0 : index
    %c0_10 = arith.constant 0 : index
    %12 = vector.load %arg5[%c0_9, %c0_10] : memref<16x1xf32, #tpu.memory_space<vmem>>, vector<16x1xf32>
    %13 = vector.broadcast %12 : vector<16x1xf32> to vector<16x128xf32>
    %14 = arith.addf %11, %13 : vector<16x128xf32>
    %cst_11 = arith.constant 0.00999999977 : f32
    %15 = vector.broadcast %cst_11 : f32 to vector<16x128xf32>
    %16 = arith.mulf %15, %14 : vector<16x128xf32>
    %17 = arith.maximumf %14, %16 : vector<16x128xf32>
    %c0_12 = arith.constant 0 : index
    %c0_13 = arith.constant 0 : index
    %18 = vector.load %arg6[%c0_12, %c0_13] : memref<16x1xf32, #tpu.memory_space<vmem>>, vector<16x1xf32>
    %19 = vector.broadcast %18 : vector<16x1xf32> to vector<16x128xf32>
    %20 = arith.mulf %19, %17 : vector<16x128xf32>
    %cst_14 = arith.constant dense<0.000000e+00> : vector<128xf32>
    %21 = vector.multi_reduction <add>, %20, %cst_14 [0] : vector<16x128xf32> to vector<128xf32>
    %22 = vector.shape_cast %21 : vector<128xf32> to vector<1x128xf32>
    %c0_15 = arith.constant 0 : index
    %c0_16 = arith.constant 0 : index
    %23 = vector.load %arg7[%c0_15, %c0_16] : memref<1x1xf32, #tpu.memory_space<vmem>>, vector<1x1xf32>
    %24 = vector.broadcast %23 : vector<1x1xf32> to vector<1x128xf32>
    %25 = arith.addf %22, %24 : vector<1x128xf32>
    %26 = arith.negf %25 : vector<1x128xf32>
    %27 = math.exp %26 : vector<1x128xf32>
    %cst_17 = arith.constant 1.000000e+00 : f32
    %28 = vector.broadcast %cst_17 : f32 to vector<1x128xf32>
    %29 = arith.addf %28, %27 : vector<1x128xf32>
    %30 = arith.divf %28, %29 : vector<1x128xf32>
    %31 = arith.truncf %30 : vector<1x128xf32> to vector<1x128xbf16>
    %c0_18 = arith.constant 0 : index
    %c0_19 = arith.constant 0 : index
    %32 = vector.load %arg8[%c0_18, %c0_19] : memref<1x128xbf16, #tpu.memory_space<vmem>>, vector<1x128xbf16>
    tpu.vector_store %arg8[%c0_18, %c0_19], %31 {strides = array<i32>} : memref<1x128xbf16, #tpu.memory_space<vmem>>, vector<1x128xbf16>,
    return
  }
  func.func @transform_0(%arg0: i32) -> (i32, i32) {
    %c0_i32 = arith.constant 0 : i32
    %c0_i32_0 = arith.constant 0 : i32
    return %arg0, %c0_i32 : i32, i32
  }
  func.func @transform_1(%arg0: i32) -> (i32, i32) {
    %c0_i32 = arith.constant 0 : i32
    %c0_i32_0 = arith.constant 0 : i32
    %c0_i32_1 = arith.constant 0 : i32
    return %c0_i32, %c0_i32_0 : i32, i32
  }
  func.func @transform_2(%arg0: i32) -> (i32, i32) {
    %c0_i32 = arith.constant 0 : i32
    %c0_i32_0 = arith.constant 0 : i32
    %c0_i32_1 = arith.constant 0 : i32
    return %c0_i32, %c0_i32_0 : i32, i32
  }
  func.func @transform_3(%arg0: i32) -> (i32, i32) {
    %c0_i32 = arith.constant 0 : i32
    %c0_i32_0 = arith.constant 0 : i32
    %c0_i32_1 = arith.constant 0 : i32
    return %c0_i32, %c0_i32_0 : i32, i32
  }
  func.func @transform_4(%arg0: i32) -> (i32, i32) {
    %c0_i32 = arith.constant 0 : i32
    %c0_i32_0 = arith.constant 0 : i32
    %c0_i32_1 = arith.constant 0 : i32
    return %c0_i32, %c0_i32_0 : i32, i32
  }
  func.func @transform_5(%arg0: i32) -> (i32, i32) {
    %c0_i32 = arith.constant 0 : i32
    %c0_i32_0 = arith.constant 0 : i32
    %c0_i32_1 = arith.constant 0 : i32
    return %c0_i32, %c0_i32_0 : i32, i32
  }
  func.func @transform_6(%arg0: i32) -> (i32, i32) {
    %c0_i32 = arith.constant 0 : i32
    %c0_i32_0 = arith.constant 0 : i32
    %c0_i32_1 = arith.constant 0 : i32
    return %c0_i32, %c0_i32_0 : i32, i32
  }
  func.func @transform_7(%arg0: i32) -> (i32, i32) {
    %c0_i32 = arith.constant 0 : i32
    %c0_i32_0 = arith.constant 0 : i32
    return %c0_i32, %arg0 : i32, i32
  }
}

</mosaic_0001>

<bundles_post_ra>
// kernel: tpu_custom_call.1
= control target key start
LH: loop header
LB: loop body
LE: loop exit
PB: predicated region body
PF: predicated region fallthrough
CT: control target
= control target key end

     0   :  { %s1025_s0 = inlined_call_operand.vmem [shape: f32[200,8], index: 0, kind: input, shape index: {}]   ;;  %s1026_s1 = inlined_call_operand.vmem [shape: bf16[32,8], index: 1, kind: input, shape index: {}]   ;;  %s1027_s2 = inlined_call_operand.vmem [shape: f32[32,1], index: 2, kind: input, shape index: {}]   ;;  %s1028_s3 = inlined_call_operand.vmem [shape: bf16[16,32], index: 3, kind: input, shape index: {}]   ;;  %s1029_s4 = inlined_call_operand.vmem [shape: f32[16,1], index: 4, kind: input, shape index: {}]   ;;  %s1030_s5 = inlined_call_operand.vmem [shape: f32[16,1], index: 5, kind: input, shape index: {}]   ;;  %s1031_s6 = inlined_call_operand.<no memory space> [shape: f32[1,1], index: 6, kind: input, shape index: {}]   ;;  %s1032_s7 = inlined_call_operand.hbm [shape: bf16[1,200], index: 7, kind: output, shape index: {}]  }
   0x1   :  { %v12_v0 = vstv %s1031_s6 }
   0x2   :  { %13 = vst [vmem:[#allocation2] sm:$0x1] %v12_v0 }
   0x3   :  { %14 = vsyncpa [#allocation4], 0 }
   0x4   :  { %16 = vsyncpa [#allocation4 + $0x1], 0  ;;  %s857_s26 = smov 0   ;;  %s859_s27 = smov 0  }
   0x5   :  { %s861_s28 = smov 0   ;;  %s863_s29 = smov 0  }
   0x6 LB: > { %s629_s6 = sadd.s32 4294967295, %s808_s29   ;;  %s630_s30 = sadd.s32 4294967294, %s808_s29   ;;  %s808_s29 = sphi %s863_s29, %s1038_s29   ;;  %s804_s28 = sphi %s861_s28, %s1037_s28   ;;  %s800_s27 = sphi %s859_s27, %s1036_s27   ;;  %s796_s26 = sphi %s857_s26, %s1035_s26  }
   0x7   : > { %s880_s8 = sadd.s32 1, %s808_s29   ;;  %s181_s9 = sadd.s32 1, %s804_s28 }
   0x8   : > { %s178_s10 = ssub.s32 %s808_s29, %s880_s8  ;;  %p191_p0 = scmp.ne.s32.totalorder %s804_s28, %s800_s27 }
   0x9   : > { %p179_p1 = scmp.eq.s32.totalorder %s178_s10, 0  ;;  %p192_p2 = scmp.eq.s32.totalorder %s629_s6, 1 }
   0xa   : > { %p197_p3 = scmp.ne.s32.totalorder %s800_s27, %s796_s26  ;;  %p198_p4 = scmp.eq.s32.totalorder %s630_s30, 1 }
   0xb   : > { %s890_s11 = scalar_select %p179_p1, %s804_s28, %s181_s9  }
   0xc   : > { %p892_p5 = por %p192_p2, %p191_p0  ;;  %p896_p6 = por %p198_p4, %p197_p3 }
   0xd   : > { %p633_p7 = scmp.ge.s32.totalorder %s808_s29, 1  ;;  %p251_p8 = scmp.lt.s32.totalorder %s808_s29, 3 }
   0xf   : > { %p252_p9 = pnand %p633_p7, %p251_p8 }
  0x10   : > { %s902_s14 = sshll.u32 (!%p252_p9), %s629_s6, 4  ;;  %v739_v1 = vld [vmem:[%s1026_s1] sm:$0xff] (!%p252_p9)   ;;  %vm363_vm0 = vcmask (!%p252_p9), 64512   ;;  %v810_v3 = vmov (!%p252_p9), 0   ;;  %v331_v4 = vld [vmem:[%s1027_s2 + $0x10] sm:$0xff] (!%p252_p9)  ;;  %v330_v5 = vld [vmem:[%s1027_s2 + $0x8] sm:$0xff] (!%p252_p9) }
  0x11   : > { %255 = sbr.rel (%p252_p9) target bundleno = 604 (0x25c), region = 48  ;;  %p291_p10 = scmp.lt.s32.totalorder (!%p252_p9), %s902_s14, 24  ;;  %v329_v2 = vld [vmem:[%s1027_s2] sm:$0xff] (!%p252_p9)  ;;  %675 = vmatprep.mubr.msk.bf16.mxu0 (!%p252_p9), %vm363_vm0, %v739_v1  ;;  %737 = vset.pattern.permute.xlu0 (!%p252_p9), %v810_v3  ;;  %v332_v6 = vld [vmem:[%s1027_s2 + $0x18] sm:$0xff] (!%p252_p9)  ;;  %v452_v15 = vld [vmem:[%s1029_s4 + $0x8] sm:$0xff] (!%p252_p9)  ;;  %v811_v45 = vmov (!%p252_p9), 0.0  }
  0x12   : > { %335 = vperm.xlu0 (!%p252_p9), %737, %v329_v2   ;;  %738 = vset.pattern.permute.xlu1 (!%p252_p9), %v810_v3  ;;  %v451_v13 = vld [vmem:[%s1029_s4] sm:$0xff] (!%p252_p9)  ;;  %v518_v19 = vld [vmem:[%s1030_s5 + $0x8] sm:$0xff] (!%p252_p9)  ;;  %vm812_vm1 = vmmov (!%p252_p9), 0   ;;  %vm468_vm2 = vcmask (!%p252_p9), 261120   ;;  %vm556_vm3 = vcmask (!%p252_p9), 1040384   ;;  %s983_s17 = scalar_lea.hbm (!%p252_p9), %s1032_s7, %s902_s14  ;;  %s813_s20 = smov (!%p252_p9), [#allocation3]  }
  0x13   : > { %345 = vperm.xlu1 (!%p252_p9), %738, %v331_v4   ;;  %v517_v18 = vld [vmem:[%s1030_s5] sm:$0xff] (!%p252_p9)  ;;  %v740_v44 = vld [vmem:[%s1026_s1 + $0x8] sm:$0xff] (!%p252_p9)   ;;  %679 = vmatprep.subr.bf16.mxu1 (!%p252_p9), %v811_v45  ;;  %vm557_vm4 = vsmask.f32 (!%p252_p9), 256  ;;  %s750_s21 = sshll.u32 (!%p252_p9), %s813_s20, 4  ;;  %s751_s21 = int_to_ptr.vmem [resolvable:$false] %s750_s21 }
  0x14   : > { %v538_v22 = vld [vmem:[#allocation2] sm:$0x1] (!%p252_p9)  ;;  %683 = vmatprep.mubr.msk.bf16.mxu1 (!%p252_p9), %vm812_vm1, %v811_v45  ;;  %vm558_vm5 = vmand (!%p252_p9), %vm556_vm3, %vm557_vm4 }
  0x15   : > { %v741_v0 = vld [vmem:[%s1028_s3] sm:$0xff] (!%p252_p9)  }
  0x16   : > { %340 = vperm.xlu0 (!%p252_p9), %737, %v330_v5  }
  0x17   : > { %350 = vperm.xlu1 (!%p252_p9), %738, %v332_v6  }
  0x18   : > { %s292_s19 = scalar_select %p291_p10, %s902_s14, 24 }
  0x1a   : > { %s635_s22 = sshll.u32 %s292_s19, 3  ;;  %455 = vperm.xlu0 %737, %v451_v13  }
  0x1b   : > { %s922_s30 = scalar_lea.vmem %s1025_s0, %s635_s22  ;;  %460 = vperm.xlu1 %738, %v452_v15   ;;  %s752_s22 = scalar_lea.vmem %s751_s21, 32 }
  0x1c   : > { %v301_v7 = vld [vmem:[%s922_s30] sm:$0xff]  ;;  %v302_v8 = vld [vmem:[%s922_s30 + $0x8] sm:$0xff]  ;;  %v303_v9 = vld [vmem:[%s922_s30 + $0x10] sm:$0xff] }
  0x1d   : > { %v317_v10 = vpack.c.bf16 %v302_v8, %v301_v7  ;;  %v304_v11 = vld [vmem:[%s922_s30 + $0x18] sm:$0xff]  ;;  %v305_v16 = vld [vmem:[%s922_s30 + $0x20] sm:$0xff]  ;;  %v306_v17 = vld [vmem:[%s922_s30 + $0x28] sm:$0xff] }
  0x1e   : > { %v318_v12 = vpack.c.bf16 %v304_v11, %v303_v9  ;;  %v319_v21 = vpack.c.bf16 %v306_v17, %v305_v16  ;;  %521 = vperm.xlu0 %737, %v517_v18   ;;  %v307_v23 = vld [vmem:[%s922_s30 + $0x30] sm:$0xff]  ;;  %v308_v24 = vld [vmem:[%s922_s30 + $0x38] sm:$0xff]  ;;  %v309_v27 = vld [vmem:[%s922_s30 + $0x40] sm:$0xff]  ;;  %v544_v17 = vlaneseq }
  0x1f   : > { %687 = vmatprep.subr.msk.bf16.mxu0 %vm363_vm0, %v317_v10  ;;  %v371_v14 = vsel %vm363_vm0, %v317_v10, 0  ;;  %526 = vperm.xlu1 %738, %v518_v19   ;;  %v320_v26 = vpack.c.bf16 %v308_v24, %v307_v23  ;;  %v310_v28 = vld [vmem:[%s922_s30 + $0x48] sm:$0xff]  ;;  %v311_v31 = vld [vmem:[%s922_s30 + $0x50] sm:$0xff]  ;;  %v312_v32 = vld [vmem:[%s922_s30 + $0x58] sm:$0xff] }
  0x20   : > { %660 = vmatpush3.bf16.xpose.msra.mxu0 %v371_v14  ;;  %v374_v20 = vsel %vm363_vm0, %v318_v12, 0  ;;  %v377_v25 = vsel %vm363_vm0, %v319_v21, 0  ;;  %v321_v30 = vpack.c.bf16 %v310_v28, %v309_v27  ;;  %v322_v34 = vpack.c.bf16 %v312_v32, %v311_v31  ;;  %v313_v35 = vld [vmem:[%s922_s30 + $0x60] sm:$0xff]  ;;  %v314_v36 = vld [vmem:[%s922_s30 + $0x68] sm:$0xff]  ;;  %v315_v39 = vld [vmem:[%s922_s30 + $0x70] sm:$0xff] }
  0x21   : > { %688 = vmatprep.subr.msk.bf16.mxu0 %vm363_vm0, %v318_v12  ;;  %v380_v29 = vsel %vm363_vm0, %v320_v26, 0  ;;  %v323_v38 = vpack.c.bf16 %v314_v36, %v313_v35  ;;  %v316_v40 = vld [vmem:[%s922_s30 + $0x78] sm:$0xff]  ;;  %s284_s30 = sand.u32 1, %s800_s27  }
  0x22   : > { %541 = vperm.xlu0 %737, %v538_v22   ;;  %v383_v33 = vsel %vm363_vm0, %v321_v30, 0  ;;  %v386_v37 = vsel %vm363_vm0, %v322_v34, 0  ;;  %v324_v42 = vpack.c.bf16 %v316_v40, %v315_v39  ;;  %s285_s9 = scalar_lea.vmem [#allocation3], %s284_s30  ;;  %s563_s18 = scalar_lea.sflag [#allocation4], %s284_s30 }
  0x23   : > { %v389_v41 = vsel %vm363_vm0, %v323_v38, 0  ;;  %s575_s10 = sshll.u32 %s285_s9, 4  ;;  %s985_s10 = int_to_ptr.vmem [resolvable:$true] %s575_s10 }
  0x24   : > { %v392_v43 = vsel %vm363_vm0, %v324_v42, 0  ;;  %s746_s19 = scalar_lea.vmem %s985_s10, 16  ;;  %p753_p0 = scmp.lt.s32.totalorder %s985_s10, %s751_s21 }
  0x25   : > { %p747_p11 = scmp.ne.s32.totalorder %s985_s10, %s746_s19  ;;  %p754_p1 = scmp.lt.s32.totalorder %s752_s22, %s746_s19 }
  0x27   : > { %p748_p12 = pnand %p747_p11, %p892_p5  ;;  %p755_p2 = por %p754_p1, %p753_p0 }
  0x28   : > { %662 = vmatpush3.bf16.xpose.msra.mxu0 %v374_v20  ;;  %v545_v20 = vshrl.u32 %v544_v17, 7 }
  0x29   : > { %689 = vmatprep.subr.msk.bf16.mxu0 %vm363_vm0, %v319_v21  ;;  %p749_p13 = pneg %p748_p12 }
  0x2a   : > { %v546_v23 = vsub.s32 0, %v545_v20 }
  0x2b   : > { %p756_p3 = pnand %p755_p2, %p749_p13 }
  0x30   : > { %664 = vmatpush3.bf16.xpose.msra.mxu0 %v377_v25 }
  0x31   : > { %690 = vmatprep.subr.msk.bf16.mxu0 %vm363_vm0, %v320_v26 }
  0x38   : > { %666 = vmatpush3.bf16.xpose.msra.mxu0 %v380_v29 }
  0x39   : > { %691 = vmatprep.subr.msk.bf16.mxu0 %vm363_vm0, %v321_v30 }
  0x40   : > { %668 = vmatpush3.bf16.xpose.msra.mxu0 %v383_v33 }
  0x41   : > { %692 = vmatprep.subr.msk.bf16.mxu0 %vm363_vm0, %v322_v34  ;;  %v559_v34 = vld [vmem:[%s285_s9] sm:$0x1] }
  0x48   : > { %670 = vmatpush3.bf16.xpose.msra.mxu0 %v386_v37 }
  0x49   : > { %693 = vmatprep.subr.msk.bf16.mxu0 %vm363_vm0, %v323_v38 }
  0x50   : > { %672 = vmatpush3.bf16.xpose.msra.mxu0 %v389_v41 }
  0x51   : > { %694 = vmatprep.subr.msk.bf16.mxu0 %vm363_vm0, %v324_v42 }
  0x58   : > { %674 = vmatpush3.bf16.xpose.msra.mxu0 %v392_v43 }
  0x5f   : > { %676 = vmatmul.mubr.msk.bf16.vlgmr.msra.gmra.mrb[0].mxu0 %vm363_vm0, %v740_v44 }
  0x91   : > { %v336_v47 = vpop.permute.xlu0 %335 }
  0x92   : > { %v346_v46 = vpop.permute.xlu1 %345 }
  0x95   : > { %v341_v54 = vpop.permute.xlu0 %340 }
  0x96   : > { %v351_v51 = vpop.permute.xlu1 %350 }
  0x99   : > { %v456_v1 = vpop.permute.xlu0 %455 }
  0x9a   : > { %v461_v5 = vpop.permute.xlu1 %460 }
  0x9d   : > { %v522_v13 = vpop.permute.xlu0 %521 }
  0x9e   : > { %v527_v14 = vpop.permute.xlu1 %526 }
  0xa1   : > { %v542_v25 = vpop.permute.xlu0 %541 }
  0xa2   : > { %v547_v27 = vrot.slane %v542_v25, %v546_v23 }
 0x132   : > { %v677_v48 = vpop.f32.mrb[0].mxu0 }
 0x133   : > { %v437_v49 = vadd.f32 %v677_v48, %v346_v46  ;;  %v428_v50 = vpop.f32.mrb[1].mxu0 }
 0x134   : > { %v429_v52 = vadd.f32 %v428_v50, %v336_v47  ;;  %v678_v53 = vpop.f32.mrb[2].mxu0 }
 0x135   : > { %v440_v55 = vadd.f32 %v678_v53, %v351_v51  ;;  %v431_v56 = vpop.f32.mrb[3].mxu0  ;;  %v445_v58 = vmax.f32 %v437_v49, 0.0 }
 0x136   : > { %v432_v57 = vadd.f32 %v431_v56, %v341_v54  ;;  %v443_v60 = vmax.f32 %v429_v52, 0.0 }
 0x137   : > { %v446_v59 = vmax.f32 %v440_v55, 0.0 }
 0x138   : > { %v444_v61 = vmax.f32 %v432_v57, 0.0 }
 0x139   : > { %v450_v62 = vpack.c.bf16 %v446_v59, %v445_v58 }
 0x13a   : > { %v449_v63 = vpack.c.bf16 %v444_v61, %v443_v60 }
 0x13c   : > { %680 = vmatpush3.bf16.msra.mxu1 %v449_v63 }
 0x13d   : > { %681 = vmatprep.subr.bf16.mxu1 %v811_v45 }
 0x140   : > { %682 = vmatpush3.bf16.msra.mxu1 %v450_v62 }
 0x143   : > { %684 = vmatmul.mubr.msk.bf16.vlgmr.msra.gmra.mrb[0].mxu1 %vm468_vm2, %v741_v0 }
 0x216   : > { %v506_v2 = vpop.f32.mrb[0].mxu1 }
 0x217   : > { %v507_v3 = vadd.f32 %v506_v2, %v456_v1  ;;  %v685_v4 = vpop.f32.mrb[1].mxu1 }
 0x218   : > { %v509_v6 = vpop.f32.mrb[2].mxu1 }
 0x219   : > { %v513_v7 = vmul.f32 0.01, %v507_v3  ;;  %v510_v8 = vadd.f32 %v509_v6, %v461_v5  ;;  %v686_v9 = vpop.f32.mrb[3].mxu1 }
 0x21b   : > { %v515_v10 = vmax.f32 %v507_v3, %v513_v7  ;;  %v514_v11 = vmul.f32 0.01, %v510_v8 }
 0x21d   : > { %v516_v12 = vmax.f32 %v510_v8, %v514_v11  ;;  %v529_v15 = vmul.f32 %v522_v13, %v515_v10 }
 0x21f   : > { %v530_v16 = vmul.f32 %v527_v14, %v516_v12 }
 0x221   : > { %v531_v18 = vadd.f32 %v530_v16, %v529_v15 }
 0x223   : > { %v532_v19 = vrot.slane %v531_v18, 4 }
 0x225   : > { %v533_v21 = vadd.f32 %v532_v19, %v531_v18 }
 0x227   : > { %v534_v22 = vrot.slane %v533_v21, 2 }
 0x229   : > { %v535_v24 = vadd.f32 %v534_v22, %v533_v21 }
 0x22b   : > { %v536_v26 = vrot.slane %v535_v24, 1 }
 0x22d   : > { %v537_v28 = vadd.f32 %v536_v26, %v535_v24 }
 0x22f   : > { %v548_v29 = vadd.f32 %v547_v27, %v537_v28 }
 0x231   : > { %v642_v30 = vmul.f32 -1.442695, %v548_v29 }
 0x233   : > { %742 = vpow2.f32 %v642_v30 }
 0x23d   : > { %v743_v31 = vpop.eup %742 }
 0x23e   : > { %v552_v32 = vadd.f32 1.0, %v743_v31 }
 0x240   : > { %744 = vrcp.f32 %v552_v32 }
 0x24a   : > { %v745_v33 = vpop.eup %744 }
 0x24b   : > { %v555_v35 = vpack.c.bf16 %v745_v33, %v745_v33 }
 0x24d   : > { %v560_v36 = vsel %vm558_vm5, %v555_v35, %v559_v34 }
 0x24e   : > { %561 = vst [vmem:[%s285_s9] sm:$0x1] %v560_v36 }
 0x24f   : > { %759 = shalt.err (!%p756_p3)
}
 0x250   : > { %s760_s14 = scalar_lea.hbm %s983_s17, 16  ;;  %s764_s25 = scalar_lea.hbm %s1032_s7, 32 }
 0x251   : > { %p761_p4 = scmp.ne.s32.totalorder %s983_s17, %s760_s14  ;;  %p765_p9 = scmp.lt.u32.totalorder %s983_s17, %s1032_s7 }
 0x252   : > { %p766_p10 = scmp.lt.u32.totalorder %s764_s25, %s760_s14  ;;  %p768_p12 = scmp.lt.u32.totalorder %s760_s14, %s983_s17 }
 0x253   : > { %p762_p7 = pnand %p761_p4, %p892_p5 }
 0x254   : > { %p767_p11 = por %p766_p10, %p765_p9 }
 0x255   : > { %p763_p8 = pneg %p762_p7 }
 0x256   : > { %p769_p13 = por %p768_p12, %p767_p11 }
 0x258   : > { %p770_p0 = pnand %p769_p13, %p763_p8 }
 0x25a   : > { %773 = shalt.err (!%p770_p0)
}
 0x25b   : > { %695 = dma.vmem_to_hbm [thread:$0]  (%p892_p5), %s985_s10, 16, %s983_s17, %s563_s18  }
 0x25c PF: > { %p701_p1 = scmp.ge.s32.totalorder %s808_s29, 2  ;;  %s587_s9 = sand.u32 1, %s796_s26  }
 0x25d   : > { %s588_s15 = scalar_lea.sflag [#allocation4], %s587_s9 }
 0x25e   : > { %p698_p2 = pnand %p701_p1, %p896_p6 }
 0x260   : > { %791 = dma.done.wait (!%p698_p2), %s588_s15, 16  }
 0x261   : > { %793 = vsyncadd (!%p698_p2), %s588_s15, 4294967280  ;;  %p19_p3 = scmp.ge.s32.totalorder %s880_s8, 4   ;;  %s1035_s26 = smov %s800_s27 }
 0x262   : > { %s1036_s27 = smov %s804_s28  ;;  %s1037_s28 = smov %s890_s11 }
 0x263   : > { %s1038_s29 = smov %s880_s8  ;;  %21 = sbr.rel (!%p19_p3) target bundleno = 6 (0x6), region = 83 }
 0x26a   :  { %592 = vsyncpa [#allocation4], 1 }
 0x26b   :  { %594 = vsyncpa [#allocation4 + $0x1], 1 }

</bundles_post_ra>
